<compile_context>
chip_gen: v6e
topology: v6e:2x2x1
jax: 0.10.0
libtpu: 0.0.40
codegen_flags: <defaults>
</compile_context>

<pallas_src>
import math

import jax
import jax.numpy as jnp
import numpy as np
from jax import lax
from jax.experimental import pallas as pl
from jax.experimental.pallas import tpu as pltpu  # noqa: F401

# ---------------- problem sizes (small, consistent with the module) ----------
B = 2            # batch
S = 8            # seq_len
D = 32           # model dim
HIDDEN = 64      # mlp hidden_dim
NUM_HEADS = 8
HEAD_DIM = D // NUM_HEADS
BS = B * S       # 16 rows
HB = NUM_HEADS * BS   # 128 -> lane-dense score-slab width
EPS = 1e-5


def _rmsnorm(x, w):
    # Matches the PyTorch module exactly: denom = sqrt(mean(x^2)) + eps
    norm = jnp.sqrt(jnp.mean(x * x, axis=-1, keepdims=True)) + EPS
    return x * pl.reciprocal(norm, approx=True) * w


def decoder_layer_kernel(
    x_ref,        # (BS, D)
    wq_ref,       # (D, D)   pre-transposed, 1/sqrt(head_dim) folded in
    wk_ref,       # (D, D)   pre-transposed
    wv_ref,       # (D, D)   pre-transposed
    wo_ref,       # (D, D)   pre-transposed
    wg_ref,       # (D, HIDDEN)
    wu_ref,       # (D, HIDDEN)
    wd_ref,       # (HIDDEN, D)
    ln1_ref,      # (1, D)
    ln2_ref,      # (1, D)
    hmask_ref,    # (HB, D)  head block-diag 0/1 selector for tiled k/v
    bmask_ref,    # (BS, HB) batch block-diag additive mask (0 / -1e30)
    segsum_ref,   # (HB, NUM_HEADS) per-head segment-sum matrix
    hexp_ref,     # (NUM_HEADS, D)  expand per-head scalar across its D columns
    out_ref,      # (BS, D)
):
    f32 = jnp.float32
    x = x_ref[...]                                            # (BS, D)

    # ---------------- input RMSNorm ----------------
    xn = _rmsnorm(x, ln1_ref[...])

    # ---------------- q/k/v projections (lane-aligned) ----------------
    q = jnp.dot(xn, wq_ref[...], preferred_element_type=f32)  # (BS, D), pre-scaled
    k = jnp.dot(xn, wk_ref[...], preferred_element_type=f32)
    v = jnp.dot(xn, wv_ref[...], preferred_element_type=f32)

    # ---------------- attention: all heads in one lane-dense slab -----------
    hmask = hmask_ref[...]                                     # (HB, D)
    k_big = jnp.concatenate([k] * NUM_HEADS, axis=0) * hmask   # (HB, D)
    v_big = jnp.concatenate([v] * NUM_HEADS, axis=0) * hmask   # (HB, D)

    # scores for every (head, key): (BS, HB) = (16, 128), one MXU push
    s = lax.dot_general(q, k_big, (((1,), (1,)), ((), ())),
                        preferred_element_type=f32)
    s = s + bmask_ref[...]                                     # batch block-diag mask

    # one softmax over the slab.  A global per-row max is a valid shift
    # (softmax is shift-invariant per head segment); with normed inputs the
    # per-head score ranges are close, so no underflow concern.
    s = s - jnp.max(s, axis=-1, keepdims=True)
    p = jnp.exp(s)                                             # masked entries -> 0

    denom = jnp.dot(p, segsum_ref[...], preferred_element_type=f32)   # (BS, H)
    inv = pl.reciprocal(denom, approx=True)                            # (BS, H)
    ctx = jnp.dot(p, v_big, preferred_element_type=f32)                # (BS, D)
    ctx = ctx * jnp.dot(inv, hexp_ref[...], preferred_element_type=f32)  # per-head norm

    x = x + jnp.dot(ctx, wo_ref[...], preferred_element_type=f32)     # residual 1

    # ---------------- post-attention RMSNorm ----------------
    xn2 = _rmsnorm(x, ln2_ref[...])

    # ---------------- MLP (SiLU applied to gate*up, as in the module) -------
    g = jnp.dot(xn2, wg_ref[...], preferred_element_type=f32)  # (BS, HIDDEN)
    u = jnp.dot(xn2, wu_ref[...], preferred_element_type=f32)
    gu = g * u
    act = gu * jax.nn.sigmoid(gu)                              # SiLU(gate * up)
    out_ref[...] = x + jnp.dot(act, wd_ref[...], preferred_element_type=f32)


def _static_masks():
    rows = np.arange(HB)                       # slab row/col index: h*BS + j
    cols_d = np.arange(D)
    # head block-diag selector for sublane-tiled k/v: (HB, D)
    hmask = (rows[:, None] // BS == cols_d[None, :] // HEAD_DIM).astype(np.float32)
    # batch block-diag additive mask on the score slab: (BS, HB)
    qrows = np.arange(BS)
    key_j = rows % BS
    bmask = np.where(qrows[:, None] // S == key_j[None, :] // S,
                     0.0, -1e30).astype(np.float32)
    # per-head segment-sum matrix: (HB, NUM_HEADS)
    segsum = (rows[:, None] // BS == np.arange(NUM_HEADS)[None, :]).astype(np.float32)
    # expand one scalar per head across that head's D columns: (NUM_HEADS, D)
    hexp = (np.arange(NUM_HEADS)[:, None] == cols_d[None, :] // HEAD_DIM).astype(np.float32)
    return (jnp.asarray(hmask), jnp.asarray(bmask),
            jnp.asarray(segsum), jnp.asarray(hexp))


def llama_decoder_layer(x, params):
    """x: (B, S, D) float32. params: PyTorch-layout weights (out_features, in_features)."""
    inv_scale = 1.0 / math.sqrt(HEAD_DIM)
    wq_t = params["wq"].T * inv_scale          # fold attention scale into wq
    wk_t = params["wk"].T
    wv_t = params["wv"].T
    wo_t = params["wo"].T
    wg_t = params["wg"].T                      # (D, HIDDEN)
    wu_t = params["wu"].T                      # (D, HIDDEN)
    wd_t = params["wd"].T                      # (HIDDEN, D)
    hmask, bmask, segsum, hexp = _static_masks()

    x2 = x.reshape(BS, D)                      # collapse batch: one grid-less call

    out2 = pl.pallas_call(
        decoder_layer_kernel,
        out_shape=jax.ShapeDtypeStruct((BS, D), jnp.float32),
    )(x2, wq_t, wk_t, wv_t, wo_t, wg_t, wu_t, wd_t,
      params["ln1"], params["ln2"], hmask, bmask, segsum, hexp)
    return out2.reshape(B, S, D)


# ---------------- pure-JAX reference (mirrors the PyTorch module) ------------
def reference(x, p):
    def rms(x, w):
        norm = jnp.sqrt(jnp.mean(x * x, axis=-1, keepdims=True)) + EPS
        return x / norm * w[0]

    residual = x
    xn = rms(x, p["ln1"])
    q = xn @ p["wq"].T
    k = xn @ p["wk"].T
    v = xn @ p["wv"].T
    q = q.reshape(B, S, NUM_HEADS, HEAD_DIM).transpose(0, 2, 1, 3)
    k = k.reshape(B, S, NUM_HEADS, HEAD_DIM).transpose(0, 2, 1, 3)
    v = v.reshape(B, S, NUM_HEADS, HEAD_DIM).transpose(0, 2, 1, 3)
    scores = jnp.einsum("bhqd,bhkd->bhqk", q, k) / math.sqrt(HEAD_DIM)
    attn = jax.nn.softmax(scores, axis=-1)
    ctx = jnp.einsum("bhqk,bhkd->bhqd", attn, v)
    ctx = ctx.transpose(0, 2, 1, 3).reshape(B, S, D)
    x = ctx @ p["wo"].T + residual

    residual = x
    xn = rms(x, p["ln2"])
    g = xn @ p["wg"].T
    u = xn @ p["wu"].T
    gu = g * u
    act = gu * jax.nn.sigmoid(gu)
    return act @ p["wd"].T + residual


def init_params(key):
    ks = jax.random.split(key, 7)
    scale = 0.05
    return {
        "wq": scale * jax.random.normal(ks[0], (D, D), jnp.float32),
        "wk": scale * jax.random.normal(ks[1], (D, D), jnp.float32),
        "wv": scale * jax.random.normal(ks[2], (D, D), jnp.float32),
        "wo": scale * jax.random.normal(ks[3], (D, D), jnp.float32),
        "wg": scale * jax.random.normal(ks[4], (HIDDEN, D), jnp.float32),
        "wu": scale * jax.random.normal(ks[5], (HIDDEN, D), jnp.float32),
        "wd": scale * jax.random.normal(ks[6], (D, HIDDEN), jnp.float32),
        "ln1": jnp.ones((1, D), jnp.float32),
        "ln2": jnp.ones((1, D), jnp.float32),
    }


if __name__ == "__main__":
    key = jax.random.PRNGKey(0)
    k_x, k_p = jax.random.split(key)
    x = jax.random.normal(k_x, (B, S, D), jnp.float32)
    params = init_params(k_p)

    out = llama_decoder_layer(x, params)
    out = jax.block_until_ready(out)

    ref = jax.block_until_ready(reference(x, params))
    np.testing.assert_allclose(np.asarray(out), np.asarray(ref),
                               rtol=1e-3, atol=1e-3)
    print("KERNEL_OK")
</pallas_src>

<mosaic_0001>
module attributes {stable_mosaic.version = 11 : i64} {
  func.func @decoder_layer_kernel(%arg0: memref<16x32xf32, #tpu.memory_space<vmem>>, %arg1: memref<32x32xf32, #tpu.memory_space<vmem>>, %arg2: memref<32x32xf32, #tpu.memory_space<vmem>>, %arg3: memref<32x32xf32, #tpu.memory_space<vmem>>, %arg4: memref<32x32xf32, #tpu.memory_space<vmem>>, %arg5: memref<32x64xf32, #tpu.memory_space<vmem>>, %arg6: memref<32x64xf32, #tpu.memory_space<vmem>>, %arg7: memref<64x32xf32, #tpu.memory_space<vmem>>, %arg8: memref<1x32xf32, #tpu.memory_space<vmem>>, %arg9: memref<1x32xf32, #tpu.memory_space<vmem>>, %arg10: memref<128x32xf32, #tpu.memory_space<vmem>>, %arg11: memref<16x128xf32, #tpu.memory_space<vmem>>, %arg12: memref<128x8xf32, #tpu.memory_space<vmem>>, %arg13: memref<8x32xf32, #tpu.memory_space<vmem>>, %arg14: memref<16x32xf32, #tpu.memory_space<vmem>>) attributes {dimension_semantics = [], scalar_prefetch = 0 : i64, scratch_operands = 0 : i64, tpu.core_type = #tpu.core_type<tc>} {
    %c0 = arith.constant 0 : index
    %c0_0 = arith.constant 0 : index
    %0 = vector.load %arg0[%c0, %c0_0] : memref<16x32xf32, #tpu.memory_space<vmem>>, vector<16x32xf32>
    %c0_1 = arith.constant 0 : index
    %c0_2 = arith.constant 0 : index
    %1 = vector.load %arg8[%c0_1, %c0_2] : memref<1x32xf32, #tpu.memory_space<vmem>>, vector<1x32xf32>
    %2 = arith.mulf %0, %0 : vector<16x32xf32>
    %cst = arith.constant dense<0.000000e+00> : vector<16xf32>
    %3 = vector.multi_reduction <add>, %2, %cst [1] : vector<16x32xf32> to vector<16xf32>
    %4 = vector.shape_cast %3 : vector<16xf32> to vector<16x1xf32>
    %cst_3 = arith.constant 3.200000e+01 : f32
    %5 = vector.broadcast %cst_3 : f32 to vector<16x1xf32>
    %6 = arith.divf %4, %5 : vector<16x1xf32>
    %7 = math.sqrt %6 : vector<16x1xf32>
    %cst_4 = arith.constant 9.99999974E-6 : f32
    %8 = vector.broadcast %cst_4 : f32 to vector<16x1xf32>
    %9 = arith.addf %7, %8 : vector<16x1xf32>
    %10 = tpu.reciprocal %9 {approx = true} : vector<16x1xf32> -> vector<16x1xf32>
    %11 = vector.broadcast %10 : vector<16x1xf32> to vector<16x32xf32>
    %12 = arith.mulf %0, %11 : vector<16x32xf32>
    %13 = vector.broadcast %1 : vector<1x32xf32> to vector<16x32xf32>
    %14 = arith.mulf %12, %13 : vector<16x32xf32>
    %c0_5 = arith.constant 0 : index
    %c0_6 = arith.constant 0 : index
    %15 = vector.load %arg1[%c0_5, %c0_6] : memref<32x32xf32, #tpu.memory_space<vmem>>, vector<32x32xf32>
    %cst_7 = arith.constant dense<0.000000e+00> : vector<16x32xf32>
    %16 = tpu.matmul %14, %15, %cst_7 {dimension_numbers = #tpu.dot_dimension_numbers<[1], [0], [0], [1], [0, 0, 1, 1], [], []>} : vector<16x32xf32>, vector<32x32xf32>, vector<16x32xf32> -> vector<16x32xf32>
    %c0_8 = arith.constant 0 : index
    %c0_9 = arith.constant 0 : index
    %17 = vector.load %arg2[%c0_8, %c0_9] : memref<32x32xf32, #tpu.memory_space<vmem>>, vector<32x32xf32>
    %cst_10 = arith.constant dense<0.000000e+00> : vector<16x32xf32>
    %18 = tpu.matmul %14, %17, %cst_10 {dimension_numbers = #tpu.dot_dimension_numbers<[1], [0], [0], [1], [0, 0, 1, 1], [], []>} : vector<16x32xf32>, vector<32x32xf32>, vector<16x32xf32> -> vector<16x32xf32>
    %c0_11 = arith.constant 0 : index
    %c0_12 = arith.constant 0 : index
    %19 = vector.load %arg3[%c0_11, %c0_12] : memref<32x32xf32, #tpu.memory_space<vmem>>, vector<32x32xf32>
    %cst_13 = arith.constant dense<0.000000e+00> : vector<16x32xf32>
    %20 = tpu.matmul %14, %19, %cst_13 {dimension_numbers = #tpu.dot_dimension_numbers<[1], [0], [0], [1], [0, 0, 1, 1], [], []>} : vector<16x32xf32>, vector<32x32xf32>, vector<16x32xf32> -> vector<16x32xf32>
    %c0_14 = arith.constant 0 : index
    %c0_15 = arith.constant 0 : index
    %21 = vector.load %arg10[%c0_14, %c0_15] : memref<128x32xf32, #tpu.memory_space<vmem>>, vector<128x32xf32>
    %22 = tpu.concatenate %18, %18, %18, %18, %18, %18, %18, %18 in 0 : vector<16x32xf32>, vector<16x32xf32>, vector<16x32xf32>, vector<16x32xf32>, vector<16x32xf32>, vector<16x32xf32>, vector<16x32xf32>, vector<16x32xf32> -> vector<128x32xf32>
    %23 = arith.mulf %22, %21 : vector<128x32xf32>
    %24 = tpu.concatenate %20, %20, %20, %20, %20, %20, %20, %20 in 0 : vector<16x32xf32>, vector<16x32xf32>, vector<16x32xf32>, vector<16x32xf32>, vector<16x32xf32>, vector<16x32xf32>, vector<16x32xf32>, vector<16x32xf32> -> vector<128x32xf32>
    %25 = arith.mulf %24, %21 : vector<128x32xf32>
    %cst_16 = arith.constant dense<0.000000e+00> : vector<16x128xf32>
    %26 = tpu.matmul %16, %23, %cst_16 {dimension_numbers = #tpu.dot_dimension_numbers<[1], [1], [0], [0], [0, 0, 1, 0], [], []>} : vector<16x32xf32>, vector<128x32xf32>, vector<16x128xf32> -> vector<16x128xf32>
    %c0_17 = arith.constant 0 : index
    %c0_18 = arith.constant 0 : index
    %27 = vector.load %arg11[%c0_17, %c0_18] : memref<16x128xf32, #tpu.memory_space<vmem>>, vector<16x128xf32>
    %28 = arith.addf %26, %27 : vector<16x128xf32>
    %cst_19 = arith.constant dense<0xFF800000> : vector<16xf32>
    %29 = vector.multi_reduction <maximumf>, %28, %cst_19 [1] : vector<16x128xf32> to vector<16xf32>
    %30 = vector.shape_cast %29 : vector<16xf32> to vector<16x1xf32>
    %31 = vector.broadcast %30 : vector<16x1xf32> to vector<16x128xf32>
    %32 = arith.subf %28, %31 : vector<16x128xf32>
    %33 = math.exp %32 : vector<16x128xf32>
    %c0_20 = arith.constant 0 : index
    %c0_21 = arith.constant 0 : index
    %34 = vector.load %arg12[%c0_20, %c0_21] : memref<128x8xf32, #tpu.memory_space<vmem>>, vector<128x8xf32>
    %cst_22 = arith.constant dense<0.000000e+00> : vector<16x8xf32>
    %35 = tpu.matmul %33, %34, %cst_22 {dimension_numbers = #tpu.dot_dimension_numbers<[1], [0], [0], [1], [0, 0, 1, 1], [], []>} : vector<16x128xf32>, vector<128x8xf32>, vector<16x8xf32> -> vector<16x8xf32>
    %36 = tpu.reciprocal %35 {approx = true} : vector<16x8xf32> -> vector<16x8xf32>
    %cst_23 = arith.constant dense<0.000000e+00> : vector<16x32xf32>
    %37 = tpu.matmul %33, %25, %cst_23 {dimension_numbers = #tpu.dot_dimension_numbers<[1], [0], [0], [1], [0, 0, 1, 1], [], []>} : vector<16x128xf32>, vector<128x32xf32>, vector<16x32xf32> -> vector<16x32xf32>
    %c0_24 = arith.constant 0 : index
    %c0_25 = arith.constant 0 : index
    %38 = vector.load %arg13[%c0_24, %c0_25] : memref<8x32xf32, #tpu.memory_space<vmem>>, vector<8x32xf32>
    %cst_26 = arith.constant dense<0.000000e+00> : vector<16x32xf32>
    %39 = tpu.matmul %36, %38, %cst_26 {dimension_numbers = #tpu.dot_dimension_numbers<[1], [0], [0], [1], [0, 0, 1, 1], [], []>} : vector<16x8xf32>, vector<8x32xf32>, vector<16x32xf32> -> vector<16x32xf32>
    %40 = arith.mulf %37, %39 : vector<16x32xf32>
    %c0_27 = arith.constant 0 : index
    %c0_28 = arith.constant 0 : index
    %41 = vector.load %arg4[%c0_27, %c0_28] : memref<32x32xf32, #tpu.memory_space<vmem>>, vector<32x32xf32>
    %cst_29 = arith.constant dense<0.000000e+00> : vector<16x32xf32>
    %42 = tpu.matmul %40, %41, %cst_29 {dimension_numbers = #tpu.dot_dimension_numbers<[1], [0], [0], [1], [0, 0, 1, 1], [], []>} : vector<16x32xf32>, vector<32x32xf32>, vector<16x32xf32> -> vector<16x32xf32>
    %43 = arith.addf %0, %42 : vector<16x32xf32>
    %c0_30 = arith.constant 0 : index
    %c0_31 = arith.constant 0 : index
    %44 = vector.load %arg9[%c0_30, %c0_31] : memref<1x32xf32, #tpu.memory_space<vmem>>, vector<1x32xf32>
    %45 = arith.mulf %43, %43 : vector<16x32xf32>
    %cst_32 = arith.constant dense<0.000000e+00> : vector<16xf32>
    %46 = vector.multi_reduction <add>, %45, %cst_32 [1] : vector<16x32xf32> to vector<16xf32>
    %47 = vector.shape_cast %46 : vector<16xf32> to vector<16x1xf32>
    %cst_33 = arith.constant 3.200000e+01 : f32
    %48 = vector.broadcast %cst_33 : f32 to vector<16x1xf32>
    %49 = arith.divf %47, %48 : vector<16x1xf32>
    %50 = math.sqrt %49 : vector<16x1xf32>
    %cst_34 = arith.constant 9.99999974E-6 : f32
    %51 = vector.broadcast %cst_34 : f32 to vector<16x1xf32>
    %52 = arith.addf %50, %51 : vector<16x1xf32>
    %53 = tpu.reciprocal %52 {approx = true} : vector<16x1xf32> -> vector<16x1xf32>
    %54 = vector.broadcast %53 : vector<16x1xf32> to vector<16x32xf32>
    %55 = arith.mulf %43, %54 : vector<16x32xf32>
    %56 = vector.broadcast %44 : vector<1x32xf32> to vector<16x32xf32>
    %57 = arith.mulf %55, %56 : vector<16x32xf32>
    %c0_35 = arith.constant 0 : index
    %c0_36 = arith.constant 0 : index
    %58 = vector.load %arg5[%c0_35, %c0_36] : memref<32x64xf32, #tpu.memory_space<vmem>>, vector<32x64xf32>
    %cst_37 = arith.constant dense<0.000000e+00> : vector<16x64xf32>
    %59 = tpu.matmul %57, %58, %cst_37 {dimension_numbers = #tpu.dot_dimension_numbers<[1], [0], [0], [1], [0, 0, 1, 1], [], []>} : vector<16x32xf32>, vector<32x64xf32>, vector<16x64xf32> -> vector<16x64xf32>
    %c0_38 = arith.constant 0 : index
    %c0_39 = arith.constant 0 : index
    %60 = vector.load %arg6[%c0_38, %c0_39] : memref<32x64xf32, #tpu.memory_space<vmem>>, vector<32x64xf32>
    %cst_40 = arith.constant dense<0.000000e+00> : vector<16x64xf32>
    %61 = tpu.matmul %57, %60, %cst_40 {dimension_numbers = #tpu.dot_dimension_numbers<[1], [0], [0], [1], [0, 0, 1, 1], [], []>} : vector<16x32xf32>, vector<32x64xf32>, vector<16x64xf32> -> vector<16x64xf32>
    %62 = arith.mulf %59, %61 : vector<16x64xf32>
    %63 = arith.negf %62 : vector<16x64xf32>
    %64 = math.exp %63 : vector<16x64xf32>
    %cst_41 = arith.constant 1.000000e+00 : f32
    %65 = vector.broadcast %cst_41 : f32 to vector<16x64xf32>
    %66 = arith.addf %65, %64 : vector<16x64xf32>
    %67 = arith.divf %65, %66 : vector<16x64xf32>
    %68 = arith.mulf %62, %67 : vector<16x64xf32>
    %c0_42 = arith.constant 0 : index
    %c0_43 = arith.constant 0 : index
    %69 = vector.load %arg7[%c0_42, %c0_43] : memref<64x32xf32, #tpu.memory_space<vmem>>, vector<64x32xf32>
    %cst_44 = arith.constant dense<0.000000e+00> : vector<16x32xf32>
    %70 = tpu.matmul %68, %69, %cst_44 {dimension_numbers = #tpu.dot_dimension_numbers<[1], [0], [0], [1], [0, 0, 1, 1], [], []>} : vector<16x64xf32>, vector<64x32xf32>, vector<16x32xf32> -> vector<16x32xf32>
    %71 = arith.addf %43, %70 : vector<16x32xf32>
    %c0_45 = arith.constant 0 : index
    %c0_46 = arith.constant 0 : index
    %72 = vector.load %arg14[%c0_45, %c0_46] : memref<16x32xf32, #tpu.memory_space<vmem>>, vector<16x32xf32>
    tpu.vector_store %arg14[%c0_45, %c0_46], %71 {strides = array<i32>} : memref<16x32xf32, #tpu.memory_space<vmem>>, vector<16x32xf32>,
    return
  }
}

</mosaic_0001>

<bundles_post_ra>
// kernel: tpu_custom_call.1
= control target key start
LH: loop header
LB: loop body
LE: loop exit
PB: predicated region body
PF: predicated region fallthrough
CT: control target
= control target key end

     0   :  { %vm53_vm0 = vcmask 261120   ;;  %s2026_s0 = inlined_call_operand.vmem [shape: f32[16,32], index: 0, kind: input, shape index: {}]   ;;  %s2027_s1 = inlined_call_operand.vmem [shape: f32[32,32], index: 1, kind: input, shape index: {}]   ;;  %s2028_s2 = inlined_call_operand.vmem [shape: f32[32,32], index: 2, kind: input, shape index: {}]   ;;  %s2029_s3 = inlined_call_operand.vmem [shape: f32[32,32], index: 3, kind: input, shape index: {}]   ;;  %s2030_s4 = inlined_call_operand.vmem [shape: f32[32,32], index: 4, kind: input, shape index: {}]   ;;  %s2031_s5 = inlined_call_operand.vmem [shape: f32[32,64], index: 5, kind: input, shape index: {}]   ;;  %s2032_s6 = inlined_call_operand.vmem [shape: f32[32,64], index: 6, kind: input, shape index: {}]   ;;  %s2033_s7 = inlined_call_operand.vmem [shape: f32[64,32], index: 7, kind: input, shape index: {}]   ;;  %s2034_s8 = inlined_call_operand.vmem [shape: f32[1,32], index: 8, kind: input, shape index: {}]   ;;  %s2035_s9 = inlined_call_operand.vmem [shape: f32[1,32], index: 9, kind: input, shape index: {}]   ;;  %s2036_s10 = inlined_call_operand.vmem [shape: f32[128,32], index: 10, kind: input, shape index: {}]   ;;  %s2037_s11 = inlined_call_operand.vmem [shape: f32[16,128], index: 11, kind: input, shape index: {}]   ;;  %s2038_s12 = inlined_call_operand.vmem [shape: f32[128,8], index: 12, kind: input, shape index: {}]   ;;  %s2039_s13 = inlined_call_operand.vmem [shape: f32[8,32], index: 13, kind: input, shape index: {}]   ;;  %s2040_s14 = inlined_call_operand.hbm [shape: f32[16,32], index: 14, kind: output, shape index: {}]  }
   0x1   :  { %v1666_v0 = vld [vmem:[%s2026_s0] sm:$0xff]  ;;  %v1671_v1 = vld [vmem:[%s2026_s0 + $0x8] sm:$0xff] }
   0x2   :  { %19 = vsyncpa [#allocation3], 0  ;;  %v51_v2 = vmul.f32 %v1666_v0, %v1666_v0  ;;  %v52_v3 = vmul.f32 %v1671_v1, %v1671_v1  ;;  %v94_v6 = vld [vmem:[%s2027_s1 + $0x18] sm:$0xff]  ;;  %v93_v8 = vld [vmem:[%s2027_s1 + $0x10] sm:$0xff]  ;;  %vm692_vm5 = vcmask 64512   ;;  %vm1090_vm10 = vcmask 523264  }
   0x3   :  { %v258_v7 = vld [vmem:[%s2029_s3 + $0x18] sm:$0xff]  ;;  %1333 = vmatprep.subr.mxu1 %v94_v6  ;;  %v257_v9 = vld [vmem:[%s2029_s3 + $0x10] sm:$0xff]  ;;  %v92_v10 = vld [vmem:[%s2027_s1 + $0x8] sm:$0xff] }
   0x4   :  { %v54_v4 = vsel %vm53_vm0, %v51_v2, 0.0  ;;  %v57_v5 = vsel %vm53_vm0, %v52_v3, 0.0  ;;  %1355 = vmatprep.subr.mxu0 %v258_v7  ;;  %1334 = vmatpush3.msra.mxu1 %v94_v6  ;;  %v256_v11 = vld [vmem:[%s2029_s3 + $0x8] sm:$0xff]  ;;  %v91_v12 = vld [vmem:[%s2027_s1] sm:$0xff]  ;;  %v179_v14 = vld [vmem:[%s2028_s2 + $0x18] sm:$0xff] }
   0x5   :  { %55 = vadd.xlane.f32.xlu0 %v54_v4  ;;  %1356 = vmatpush3.msra.mxu0 %v258_v7  ;;  %v255_v13 = vld [vmem:[%s2029_s3] sm:$0xff]  ;;  %v538_v15 = vld [vmem:[%s2038_s12 + $0x78] sm:$0xff]  ;;  %v178_v39 = vld [vmem:[%s2028_s2 + $0x10] sm:$0xff] }
   0x6   :  { %1335 = vmatprep.subr.mxu1 %v93_v8  ;;  %1357 = vmatprep.subr.mxu0 %v257_v9  ;;  %v1192_v33 = vld [vmem:[%s2034_s8] ss:$0 sm:$0xff]  ;;  %v537_v40 = vld [vmem:[%s2038_s12 + $0x70] sm:$0xff]  ;;  %v177_v41 = vld [vmem:[%s2028_s2 + $0x8] sm:$0xff] }
   0x7   :  { %1336 = vmatpush3.msra.mxu1 %v93_v8  ;;  %1358 = vmatpush3.msra.mxu0 %v257_v9  ;;  %v536_v42 = vld [vmem:[%s2038_s12 + $0x68] sm:$0xff]  ;;  %v176_v43 = vld [vmem:[%s2028_s2] sm:$0xff]  ;;  %v534_v45 = vld [vmem:[%s2038_s12 + $0x58] sm:$0xff] }
   0x8   :  { %1337 = vmatprep.subr.mxu1 %v92_v10  ;;  %1359 = vmatprep.subr.mxu0 %v256_v11  ;;  %v535_v44 = vld [vmem:[%s2038_s12 + $0x60] sm:$0xff]  ;;  %v533_v46 = vld [vmem:[%s2038_s12 + $0x50] sm:$0xff]  ;;  %v532_v47 = vld [vmem:[%s2038_s12 + $0x48] sm:$0xff] }
   0x9   :  { %58 = vadd.xlane.f32.xlu0 %v57_v5  ;;  %1338 = vmatpush3.msra.mxu1 %v92_v10  ;;  %v531_v48 = vld [vmem:[%s2038_s12 + $0x40] sm:$0xff]  ;;  %v530_v49 = vld [vmem:[%s2038_s12 + $0x38] sm:$0xff]  ;;  %v529_v50 = vld [vmem:[%s2038_s12 + $0x30] sm:$0xff] }
   0xa   :  { %1339 = vmatprep.subr.mxu1 %v91_v12  ;;  %1360 = vmatpush3.msra.mxu0 %v256_v11  ;;  %v528_v51 = vld [vmem:[%s2038_s12 + $0x28] sm:$0xff]  ;;  %v527_v52 = vld [vmem:[%s2038_s12 + $0x20] sm:$0xff]  ;;  %v526_v53 = vld [vmem:[%s2038_s12 + $0x18] sm:$0xff] }
   0xb   :  { %1340 = vmatpush3.msra.mxu1 %v91_v12  ;;  %1361 = vmatprep.subr.mxu0 %v255_v13  ;;  %v525_v54 = vld [vmem:[%s2038_s12 + $0x10] sm:$0xff]  ;;  %v524_v55 = vld [vmem:[%s2038_s12 + $0x8] sm:$0xff]  ;;  %v523_v56 = vld [vmem:[%s2038_s12] sm:$0xff] }
   0xc   :  { %1344 = vmatprep.subr.mxu1 %v179_v14  ;;  %1362 = vmatpush3.msra.mxu0 %v255_v13  ;;  %v349_v57 = vld [vmem:[%s2036_s10 + $0x78] sm:$0xff]  ;;  %v347_v58 = vld [vmem:[%s2036_s10 + $0x68] sm:$0xff] }
   0xd   :  { %1401 = vmatprep.subr.mxu0 %v538_v15  ;;  %v345_v59 = vld [vmem:[%s2036_s10 + $0x58] sm:$0xff]  ;;  %v343_v60 = vld [vmem:[%s2036_s10 + $0x48] sm:$0xff] }
   0xe   :  { %v341_v61 = vld [vmem:[%s2036_s10 + $0x38] sm:$0xff]  ;;  %v339_v62 = vld [vmem:[%s2036_s10 + $0x28] sm:$0xff] }
   0xf   :  { %v337_v63 = vld [vmem:[%s2036_s10 + $0x18] sm:$0xff]  ;;  %v1798_v2 = vld [vmem:[%s2036_s10 + $0x8] sm:$0xff] }
  0x8e   :  { %v56_v16 = vpop.xlane.xlu0 %55 }
  0x8f   :  { %v61_v17 = vmul.f32 0.03125, %v56_v16 }
  0x91   :  { %1531 = vrsqrt.f32 %v61_v17  ;;  %vm65_vm1 = vcmp.eq.f32.partialorder %v61_v17, inf  ;;  %v68_v22 = vand.u32 2147483648, %v61_v17  ;;  %vm67_vm2 = vcmp.eq.f32.partialorder %v61_v17, 0.0 }
  0x92   :  { %v59_v18 = vpop.xlane.xlu0 %58 }
  0x93   :  { %v62_v19 = vmul.f32 0.03125, %v59_v18 }
  0x95   :  { %1533 = vrsqrt.f32 %v62_v19  ;;  %vm72_vm3 = vcmp.eq.f32.partialorder %v62_v19, inf  ;;  %v75_v28 = vand.u32 2147483648, %v62_v19  ;;  %vm74_vm4 = vcmp.eq.f32.partialorder %v62_v19, 0.0 }
  0x9e   :  { %v1532_v20 = vpop.eup %1531 }
  0x9f   :  { %v64_v21 = vmul.f32 %v1532_v20, %v61_v17  ;;  %v1835_v20 = vld [vmem:[%s2036_s10 + $0x60] sm:$0xff] }
  0xa1   :  { %v66_v23 = vsel %vm65_vm1, %v61_v17, %v64_v21  ;;  %v1824_v17 = vld [vmem:[%s2036_s10 + $0x70] sm:$0xff] }
  0xa2   :  { %v1534_v24 = vpop.eup %1533  ;;  %v69_v25 = vsel %vm67_vm2, %v68_v22, %v66_v23  ;;  %v1845_v23 = vld [vmem:[%s2036_s10 + $0x50] sm:$0xff] }
  0xa3   :  { %v71_v26 = vmul.f32 %v1534_v24, %v62_v19  ;;  %v77_v27 = vadd.f32 1e-05, %v69_v25 }
  0xa5   :  { %v73_v29 = vsel %vm72_vm3, %v62_v19, %v71_v26  ;;  %1535 = vrcp.f32 %v77_v27  ;;  %v1855_v26 = vld [vmem:[%s2036_s10 + $0x40] sm:$0xff] }
  0xa6   :  { %v76_v30 = vsel %vm74_vm4, %v75_v28, %v73_v29  ;;  %v1865_v29 = vld [vmem:[%s2036_s10 + $0x30] sm:$0xff] }
  0xa7   :  { %v78_v31 = vadd.f32 1e-05, %v76_v30 }
  0xa9   :  { %1537 = vrcp.f32 %v78_v31 }
  0xb2   :  { %v1536_v32 = vpop.eup %1535 }
  0xb3   :  { %v81_v34 = vmul.f32 %v1536_v32, %v1666_v0  ;;  %v1875_v32 = vld [vmem:[%s2036_s10 + $0x20] sm:$0xff] }
  0xb5   :  { %v89_v35 = vmul.f32 %v1192_v33, %v81_v34 }
  0xb6   :  { %v1538_v36 = vpop.eup %1537 }
  0xb7   :  { %v82_v37 = vmul.f32 %v1538_v36, %v1671_v1  ;;  %1341 = vmatprep.mubr.msk.f32.mxu1 %vm53_vm0, %v89_v35  ;;  %1363 = vmatprep.mubr.msk.f32.mxu0 %vm53_vm0, %v89_v35 }
  0xb9   :  { %v90_v38 = vmul.f32 %v1192_v33, %v82_v37 }
  0xbb   :  { %1342 = vmatmul.mubr.msk.f32.vlgmr.msra.gmra.mxu1 %vm53_vm0, %v90_v38  ;;  %1364 = vmatmul.mubr.msk.f32.vlgmr.msra.gmra.mxu0 %vm53_vm0, %v90_v38 }
  0xbc   :  { %1345 = vmatpush3.msra.mxu1 %v179_v14  ;;  %1352 = vmatprep.mubr.msk.f32.mxu1 %vm53_vm0, %v89_v35  ;;  %v1885_v35 = vld [vmem:[%s2036_s10 + $0x10] sm:$0xff] }
  0xbd   :  { %1346 = vmatprep.subr.mxu1 %v178_v39  ;;  %1402 = vmatpush3.msra.mxu0 %v538_v15 }
  0xbe   :  { %1347 = vmatpush3.msra.mxu1 %v178_v39  ;;  %1403 = vmatprep.subr.mxu0 %v537_v40 }
  0xbf   :  { %1348 = vmatprep.subr.mxu1 %v177_v41  ;;  %1404 = vmatpush3.msra.mxu0 %v537_v40 }
  0xc0   :  { %1349 = vmatpush3.msra.mxu1 %v177_v41  ;;  %1405 = vmatprep.subr.mxu0 %v536_v42  ;;  %v382_v41 = vld [vmem:[%s2037_s11] sm:$0xff] }
  0xc1   :  { %1350 = vmatprep.subr.mxu1 %v176_v43  ;;  %1406 = vmatpush3.msra.mxu0 %v536_v42 }
  0xc2   :  { %1351 = vmatpush3.msra.mxu1 %v176_v43  ;;  %1407 = vmatprep.subr.mxu0 %v535_v44 }
  0xc3   :  { %1353 = vmatmul.mubr.msk.f32.vlgmr.msra.gmra.mxu1 %vm53_vm0, %v90_v38  ;;  %1408 = vmatpush3.msra.mxu0 %v535_v44  ;;  %v1896_v38 = vld [vmem:[%s2036_s10] sm:$0xff]  ;;  %v383_v44 = vld [vmem:[%s2037_s11 + $0x8] sm:$0xff] }
  0xc4   :  { %1409 = vmatprep.subr.mxu0 %v534_v45 }
  0xc5   :  { %1410 = vmatpush3.msra.mxu0 %v534_v45 }
  0xc6   :  { %1411 = vmatprep.subr.mxu0 %v533_v46 }
  0xc7   :  { %1412 = vmatpush3.msra.mxu0 %v533_v46 }
  0xc8   :  { %1413 = vmatprep.subr.mxu0 %v532_v47 }
  0xc9   :  { %1414 = vmatpush3.msra.mxu0 %v532_v47 }
  0xca   :  { %1415 = vmatprep.subr.mxu0 %v531_v48 }
  0xcb   :  { %1416 = vmatpush3.msra.mxu0 %v531_v48 }
  0xcc   :  { %1417 = vmatprep.subr.mxu0 %v530_v49 }
  0xcd   :  { %1418 = vmatpush3.msra.mxu0 %v530_v49 }
  0xce   :  { %1419 = vmatprep.subr.mxu0 %v529_v50 }
  0xcf   :  { %1420 = vmatpush3.msra.mxu0 %v529_v50 }
  0xd0   :  { %1421 = vmatprep.subr.mxu0 %v528_v51 }
  0xd1   :  { %1422 = vmatpush3.msra.mxu0 %v528_v51 }
  0xd2   :  { %1423 = vmatprep.subr.mxu0 %v527_v52 }
  0xd3   :  { %1424 = vmatpush3.msra.mxu0 %v527_v52 }
  0xd4   :  { %1425 = vmatprep.subr.mxu0 %v526_v53 }
  0xd5   :  { %1426 = vmatpush3.msra.mxu0 %v526_v53 }
  0xd6   :  { %1427 = vmatprep.subr.mxu0 %v525_v54 }
  0xd7   :  { %1428 = vmatpush3.msra.mxu0 %v525_v54 }
  0xd8   :  { %1429 = vmatprep.subr.mxu0 %v524_v55 }
  0xd9   :  { %1430 = vmatpush3.msra.mxu0 %v524_v55 }
  0xda   :  { %1431 = vmatprep.subr.mxu0 %v523_v56 }
  0xdb   :  { %1432 = vmatpush3.msra.mxu0 %v523_v56 }
 0x17b   :  { %v1800_v3 = vpop.f32.mrf.mxu1  ;;  %v1365_v4 = vpop.f32.mrf.mxu0 }
 0x17c   :  { %v1802_v5 = vmul.f32 %v1365_v4, %v349_v57  ;;  %v1804_v6 = vmul.f32 %v1365_v4, %v347_v58  ;;  %v1806_v7 = vmul.f32 %v1365_v4, %v345_v59  ;;  %v1808_v8 = vmul.f32 %v1365_v4, %v343_v60 }
 0x17d   :  { %v167_v9 = vpop.f32.mrf.mxu1  ;;  %v1810_v10 = vmul.f32 %v1365_v4, %v341_v61  ;;  %v1812_v11 = vmul.f32 %v1365_v4, %v339_v62  ;;  %v1814_v12 = vmul.f32 %v1365_v4, %v337_v63  ;;  %v1817_v13 = vmul.f32 %v1365_v4, %v1798_v2  ;;  %v325_v53 = vpop.f32.mrf.mxu0 }
 0x17e   :  { %1398 = vmatprep.mubr.msk.f32.mxu1 %vm53_vm0, %v167_v9  ;;  %1436 = vmatprep.subr.mxu0 %v1802_v5  ;;  %v380_v55 = vmul.f32 %v1824_v17, %v325_v53  ;;  %v378_v56 = vmul.f32 %v1835_v20, %v325_v53  ;;  %v776_v9 = vld [vmem:[%s2030_s4] sm:$0xff] }
 0x183   :  { %v1354_v14 = vpop.f32.mrf.mxu1 }
 0x184   :  { %v365_v15 = vmul.f32 %v1354_v14, %v349_v57  ;;  %v363_v19 = vmul.f32 %v1354_v14, %v347_v58  ;;  %v361_v22 = vmul.f32 %v1354_v14, %v345_v59  ;;  %v359_v25 = vmul.f32 %v1354_v14, %v343_v60 }
 0x185   :  { %v246_v16 = vpop.f32.mrf.mxu1  ;;  %v357_v28 = vmul.f32 %v1354_v14, %v341_v61  ;;  %v355_v31 = vmul.f32 %v1354_v14, %v339_v62  ;;  %v353_v34 = vmul.f32 %v1354_v14, %v337_v63  ;;  %v351_v37 = vmul.f32 %v1354_v14, %v1798_v2  ;;  %v691_v63 = vld [vmem:[%s2039_s13] sm:$0xff]  ;;  %v779_v2 = vld [vmem:[%s2030_s4 + $0x18] sm:$0xff] }
 0x186   :  { %1366 = vmatprep.subr.msk.mxu1 %vm53_vm0, %v365_v15  ;;  %v364_v18 = vmul.f32 %v1824_v17, %v246_v16  ;;  %v362_v21 = vmul.f32 %v1835_v20, %v246_v16  ;;  %v360_v24 = vmul.f32 %v1845_v23, %v246_v16  ;;  %v358_v27 = vmul.f32 %v1855_v26, %v246_v16 }
 0x187   :  { %1367 = vmatpush3.xpose.msk.msra.mxu1 %vm53_vm0, %v365_v15  ;;  %v356_v30 = vmul.f32 %v1865_v29, %v246_v16  ;;  %v354_v33 = vmul.f32 %v1875_v32, %v246_v16  ;;  %v352_v36 = vmul.f32 %v1885_v35, %v246_v16  ;;  %v350_v39 = vmul.f32 %v1896_v38, %v246_v16 }
 0x188   :  { %1368 = vmatprep.subr.msk.mxu1 %vm53_vm0, %v364_v18  ;;  %v376_v57 = vmul.f32 %v1845_v23, %v325_v53  ;;  %v374_v58 = vmul.f32 %v1855_v26, %v325_v53  ;;  %v372_v59 = vmul.f32 %v1865_v29, %v325_v53  ;;  %v370_v60 = vmul.f32 %v1875_v32, %v325_v53  ;;  %v903_v26 = vld [vmem:[%s2031_s5 + $0x8] sm:$0xff]  ;;  %v987_v29 = vld [vmem:[%s2032_s6] sm:$0xff] }
 0x189   :  { %v368_v61 = vmul.f32 %v1885_v35, %v325_v53  ;;  %v366_v62 = vmul.f32 %v1896_v38, %v325_v53  ;;  %v1089_v53 = vld [vmem:[%s2033_s7 + $0x38] sm:$0xff] }
 0x18b   :  { %1369 = vmatpush3.xpose.msk.msra.mxu1 %vm53_vm0, %v364_v18 }
 0x18c   :  { %1370 = vmatprep.subr.msk.mxu1 %vm53_vm0, %v363_v19 }
 0x18f   :  { %1371 = vmatpush3.xpose.msk.msra.mxu1 %vm53_vm0, %v363_v19 }
 0x190   :  { %1372 = vmatprep.subr.msk.mxu1 %vm53_vm0, %v362_v21 }
 0x193   :  { %1373 = vmatpush3.xpose.msk.msra.mxu1 %vm53_vm0, %v362_v21 }
 0x194   :  { %1374 = vmatprep.subr.msk.mxu1 %vm53_vm0, %v361_v22 }
 0x197   :  { %1375 = vmatpush3.xpose.msk.msra.mxu1 %vm53_vm0, %v361_v22 }
 0x198   :  { %1376 = vmatprep.subr.msk.mxu1 %vm53_vm0, %v360_v24 }
 0x19b   :  { %1377 = vmatpush3.xpose.msk.msra.mxu1 %vm53_vm0, %v360_v24  ;;  %v904_v24 = vld [vmem:[%s2031_s5 + $0x10] sm:$0xff] }
 0x19c   :  { %1378 = vmatprep.subr.msk.mxu1 %vm53_vm0, %v359_v25 }
 0x19f   :  { %1379 = vmatpush3.xpose.msk.msra.mxu1 %vm53_vm0, %v359_v25  ;;  %v989_v25 = vld [vmem:[%s2032_s6 + $0x10] sm:$0xff] }
 0x1a0   :  { %1380 = vmatprep.subr.msk.mxu1 %vm53_vm0, %v358_v27 }
 0x1a3   :  { %1381 = vmatpush3.xpose.msk.msra.mxu1 %vm53_vm0, %v358_v27  ;;  %v988_v27 = vld [vmem:[%s2032_s6 + $0x8] sm:$0xff] }
 0x1a4   :  { %1382 = vmatprep.subr.msk.mxu1 %vm53_vm0, %v357_v28 }
 0x1a7   :  { %1383 = vmatpush3.xpose.msk.msra.mxu1 %vm53_vm0, %v357_v28  ;;  %v902_v28 = vld [vmem:[%s2031_s5] sm:$0xff] }
 0x1a8   :  { %1384 = vmatprep.subr.msk.mxu1 %vm53_vm0, %v356_v30 }
 0x1ab   :  { %1385 = vmatpush3.xpose.msk.msra.mxu1 %vm53_vm0, %v356_v30 }
 0x1ac   :  { %1386 = vmatprep.subr.msk.mxu1 %vm53_vm0, %v355_v31 }
 0x1af   :  { %1387 = vmatpush3.xpose.msk.msra.mxu1 %vm53_vm0, %v355_v31 }
 0x1b0   :  { %1388 = vmatprep.subr.msk.mxu1 %vm53_vm0, %v354_v33 }
 0x1b3   :  { %1389 = vmatpush3.xpose.msk.msra.mxu1 %vm53_vm0, %v354_v33 }
 0x1b4   :  { %1390 = vmatprep.subr.msk.mxu1 %vm53_vm0, %v353_v34 }
 0x1b7   :  { %1391 = vmatpush3.xpose.msk.msra.mxu1 %vm53_vm0, %v353_v34 }
 0x1b8   :  { %1392 = vmatprep.subr.msk.mxu1 %vm53_vm0, %v352_v36 }
 0x1bb   :  { %1393 = vmatpush3.xpose.msk.msra.mxu1 %vm53_vm0, %v352_v36 }
 0x1bc   :  { %1394 = vmatprep.subr.msk.mxu1 %vm53_vm0, %v351_v37 }
 0x1bf   :  { %1395 = vmatpush3.xpose.msk.msra.mxu1 %vm53_vm0, %v351_v37 }
 0x1c0   :  { %1396 = vmatprep.subr.msk.mxu1 %vm53_vm0, %v350_v39 }
 0x1c3   :  { %1397 = vmatpush3.xpose.msk.msra.mxu1 %vm53_vm0, %v350_v39 }
 0x1c4   :  { %1471 = vmatprep.subr.mxu1 %v691_v63 }
 0x1c6   :  { %1399 = vmatmul.mubr.msk.f32.vlgmr.msra.gmra.mxu1 %vm53_vm0, %v1800_v3 }
 0x1c7   :  { %1472 = vmatpush3.msra.mxu1 %v691_v63 }
 0x1c8   :  { %1476 = vmatprep.subr.mxu1 %v779_v2 }
 0x286   :  { %v1400_v40 = vpop.f32.mrf.mxu1 }
 0x287   :  { %v510_v45 = vadd.f32 %v1400_v40, %v383_v44 }
 0x288   :  { %v504_v42 = vpop.f32.mrf.mxu1 }
 0x289   :  { %v505_v43 = vadd.f32 %v504_v42, %v382_v41 }
 0x28b   :  { %513 = vmax.xlane.f32.xlu1 %v505_v43 }
 0x28f   :  { %515 = vmax.xlane.f32.xlu1 %v510_v45 }
 0x314   :  { %v514_v46 = vpop.xlane.xlu1 %513 }
 0x315   :  { %v517_v47 = vsub.f32 %v505_v43, %v514_v46 }
 0x317   :  { %v519_v48 = vmul.f32 1.442695, %v517_v47 }
 0x318   :  { %v516_v49 = vpop.xlane.xlu1 %515 }
 0x319   :  { %1539 = vpow2.f32 %v519_v48  ;;  %v518_v50 = vsub.f32 %v510_v45, %v516_v49  ;;  %v1221_v49 = vld [vmem:[%s2035_s9] ss:$0 sm:$0xff] }
 0x31b   :  { %v521_v51 = vmul.f32 1.442695, %v518_v50 }
 0x31d   :  { %1541 = vpow2.f32 %v521_v51 }
 0x326   :  { %v1540_v52 = vpop.eup %1539 }
 0x327   :  { %1433 = vmatprep.mubr.f32.mxu0 %v1540_v52 }
 0x32a   :  { %v1542_v54 = vpop.eup %1541 }
 0x32b   :  { %1434 = vmatmul.mubr.f32.vlgmr.msra.gmra.mxu0 %v1542_v54 }
 0x32c   :  { %1437 = vmatpush3.msra.mxu0 %v1802_v5  ;;  %1468 = vmatprep.mubr.f32.mxu0 %v1540_v52 }
 0x32d   :  { %1438 = vmatprep.subr.mxu0 %v380_v55 }
 0x32e   :  { %1439 = vmatpush3.msra.mxu0 %v380_v55  ;;  %v1087_v55 = vld [vmem:[%s2033_s7 + $0x28] sm:$0xff] }
 0x32f   :  { %1440 = vmatprep.subr.mxu0 %v1804_v6 }
 0x330   :  { %1441 = vmatpush3.msra.mxu0 %v1804_v6 }
 0x331   :  { %1442 = vmatprep.subr.mxu0 %v378_v56 }
 0x332   :  { %1443 = vmatpush3.msra.mxu0 %v378_v56  ;;  %v1086_v56 = vld [vmem:[%s2033_s7 + $0x20] sm:$0xff] }
 0x333   :  { %1444 = vmatprep.subr.mxu0 %v1806_v7 }
 0x334   :  { %1445 = vmatpush3.msra.mxu0 %v1806_v7  ;;  %v778_v7 = vld [vmem:[%s2030_s4 + $0x10] sm:$0xff] }
 0x335   :  { %1446 = vmatprep.subr.mxu0 %v376_v57 }
 0x336   :  { %1447 = vmatpush3.msra.mxu0 %v376_v57  ;;  %v1085_v57 = vld [vmem:[%s2033_s7 + $0x18] sm:$0xff] }
 0x337   :  { %1448 = vmatprep.subr.mxu0 %v1808_v8 }
 0x338   :  { %1449 = vmatpush3.msra.mxu0 %v1808_v8  ;;  %v777_v8 = vld [vmem:[%s2030_s4 + $0x8] sm:$0xff] }
 0x339   :  { %1450 = vmatprep.subr.mxu0 %v374_v58 }
 0x33a   :  { %1451 = vmatpush3.msra.mxu0 %v374_v58  ;;  %v1084_v58 = vld [vmem:[%s2033_s7 + $0x10] sm:$0xff] }
 0x33b   :  { %1452 = vmatprep.subr.mxu0 %v1810_v10 }
 0x33c   :  { %1453 = vmatpush3.msra.mxu0 %v1810_v10 }
 0x33d   :  { %1454 = vmatprep.subr.mxu0 %v372_v59 }
 0x33e   :  { %1455 = vmatpush3.msra.mxu0 %v372_v59  ;;  %v1083_v59 = vld [vmem:[%s2033_s7 + $0x8] sm:$0xff] }
 0x33f   :  { %1456 = vmatprep.subr.mxu0 %v1812_v11 }
 0x340   :  { %1457 = vmatpush3.msra.mxu0 %v1812_v11 }
 0x341   :  { %1458 = vmatprep.subr.mxu0 %v370_v60 }
 0x342   :  { %1459 = vmatpush3.msra.mxu0 %v370_v60  ;;  %v1082_v60 = vld [vmem:[%s2033_s7] sm:$0xff] }
 0x343   :  { %1460 = vmatprep.subr.mxu0 %v1814_v12 }
 0x344   :  { %1461 = vmatpush3.msra.mxu0 %v1814_v12 }
 0x345   :  { %1462 = vmatprep.subr.mxu0 %v368_v61 }
 0x346   :  { %1463 = vmatpush3.msra.mxu0 %v368_v61 }
 0x347   :  { %1464 = vmatprep.subr.mxu0 %v1817_v13 }
 0x348   :  { %1465 = vmatpush3.msra.mxu0 %v1817_v13 }
 0x349   :  { %1466 = vmatprep.subr.mxu0 %v366_v62 }
 0x34a   :  { %1467 = vmatpush3.msra.mxu0 %v366_v62 }
 0x34b   :  { %1469 = vmatmul.mubr.f32.vlgmr.msra.gmra.mxu0 %v1542_v54  ;;  %v1088_v54 = vld [vmem:[%s2033_s7 + $0x30] sm:$0xff]  ;;  %s1585_s7 = smov [#allocation2]  }
 0x34c   :  { %s1181_s19 = sshll.u32 %s1585_s7, 4  ;;  %s1182_s19 = int_to_ptr.vmem [resolvable:$true] %s1181_s19 }
 0x34d   :  { %s1563_s1 = scalar_lea.vmem %s1182_s19, 256  ;;  %p1568_p1 = scmp.lt.s32.totalorder %s1182_s19, %s1182_s19 }
 0x34e   :  { %p1564_p0 = scmp.ne.s32.totalorder %s1182_s19, %s1563_s1  ;;  %p1569_p2 = scmp.lt.s32.totalorder %s1563_s1, %s1563_s1 }
 0x350   :  { %p1570_p3 = por %p1569_p2, %p1568_p1 }
 0x352   :  { %p1571_p4 = pnand %p1570_p3, %p1564_p0 }
 0x3eb   :  { %v1435_v3 = vpop.f32.mrf.mxu0 }
 0x3ed   :  { %v605_v4 = vpop.f32.mrf.mxu0 }
 0x3ee   :  { %1543 = vrcp.f32 %v605_v4 }
 0x3ef   :  { %1545 = vrcp.f32 %v1435_v3 }
 0x3fb   :  { %v1544_v5 = vpop.eup %1543 }
 0x3fc   :  { %v1546_v6 = vpop.eup %1545  ;;  %1473 = vmatprep.mubr.msk.f32.mxu1 %vm692_vm5, %v1544_v5 }
 0x3fd   :  { %1474 = vmatmul.mubr.msk.f32.vlgmr.msra.gmra.mxu1 %vm692_vm5, %v1546_v6 }
 0x3fe   :  { %1477 = vmatpush3.msra.mxu1 %v779_v2 }
 0x3ff   :  { %1478 = vmatprep.subr.mxu1 %v778_v7 }
 0x400   :  { %1479 = vmatpush3.msra.mxu1 %v778_v7 }
 0x401   :  { %1480 = vmatprep.subr.mxu1 %v777_v8 }
 0x402   :  { %1481 = vmatpush3.msra.mxu1 %v777_v8 }
 0x403   :  { %1482 = vmatprep.subr.mxu1 %v776_v9 }
 0x404   :  { %1483 = vmatpush3.msra.mxu1 %v776_v9 }
 0x40b   :  { %v1470_v10 = vpop.f32.mrf.mxu0 }
 0x40d   :  { %v682_v12 = vpop.f32.mrf.mxu0 }
 0x4bd   :  { %v1475_v11 = vpop.f32.mrf.mxu1 }
 0x4be   :  { %v775_v15 = vmul.f32 %v1475_v11, %v1470_v10 }
 0x4bf   :  { %v765_v13 = vpop.f32.mrf.mxu1 }
 0x4c0   :  { %v774_v14 = vmul.f32 %v765_v13, %v682_v12 }
 0x4c2   :  { %1484 = vmatprep.mubr.msk.f32.mxu1 %vm53_vm0, %v774_v14 }
 0x4c3   :  { %1485 = vmatmul.mubr.msk.f32.vlgmr.msra.gmra.mxu1 %vm53_vm0, %v775_v15 }
 0x583   :  { %v1486_v16 = vpop.f32.mrf.mxu1 }
 0x584   :  { %v1951_v17 = vadd.f32 %v1486_v16, %v1671_v1  ;;  %v905_v1 = vld [vmem:[%s2031_s5 + $0x18] sm:$0xff] }
 0x585   :  { %v852_v18 = vpop.f32.mrf.mxu1  ;;  %1487 = vmatprep.subr.mxu0 %v905_v1 }
 0x586   :  { %v1954_v19 = vadd.f32 %v852_v18, %v1666_v0  ;;  %v865_v20 = vmul.f32 %v1951_v17, %v1951_v17  ;;  %v990_v0 = vld [vmem:[%s2032_s6 + $0x18] sm:$0xff]  ;;  %1488 = vmatpush3.msra.mxu0 %v905_v1 }
 0x587   :  { %1498 = vmatprep.subr.mxu1 %v990_v0  ;;  %1489 = vmatprep.subr.mxu0 %v904_v24 }
 0x588   :  { %v869_v21 = vsel %vm53_vm0, %v865_v20, 0.0  ;;  %v864_v22 = vmul.f32 %v1954_v19, %v1954_v19  ;;  %1499 = vmatpush3.msra.mxu1 %v990_v0  ;;  %1490 = vmatpush3.msra.mxu0 %v904_v24 }
 0x589   :  { %870 = vadd.xlane.f32.xlu1 %v869_v21  ;;  %1500 = vmatprep.subr.mxu1 %v989_v25 }
 0x58a   :  { %v866_v23 = vsel %vm53_vm0, %v864_v22, 0.0  ;;  %1501 = vmatpush3.msra.mxu1 %v989_v25  ;;  %1491 = vmatprep.subr.mxu0 %v903_v26 }
 0x58b   :  { %867 = vadd.xlane.f32.xlu0 %v866_v23  ;;  %1502 = vmatprep.subr.mxu1 %v988_v27 }
 0x58c   :  { %1492 = vmatpush3.msra.mxu0 %v903_v26  ;;  %1503 = vmatpush3.msra.mxu1 %v988_v27 }
 0x58d   :  { %1493 = vmatprep.subr.mxu0 %v902_v28  ;;  %1504 = vmatprep.subr.mxu1 %v987_v29 }
 0x58e   :  { %1494 = vmatpush3.msra.mxu0 %v902_v28  ;;  %1505 = vmatpush3.msra.mxu1 %v987_v29 }
 0x58f   :  { %1509 = vmatprep.subr.mxu0 %v1089_v53 }
 0x612   :  { %v871_v30 = vpop.xlane.xlu1 %870 }
 0x613   :  { %v873_v31 = vmul.f32 0.03125, %v871_v30 }
 0x614   :  { %v868_v32 = vpop.xlane.xlu0 %867 }
 0x615   :  { %1547 = vrsqrt.f32 %v873_v31  ;;  %v872_v33 = vmul.f32 0.03125, %v868_v32  ;;  %vm883_vm6 = vcmp.eq.f32.partialorder %v873_v31, inf  ;;  %v886_v36 = vand.u32 2147483648, %v873_v31 }
 0x616   :  { %vm885_vm7 = vcmp.eq.f32.partialorder %v873_v31, 0.0 }
 0x617   :  { %1549 = vrsqrt.f32 %v872_v33  ;;  %vm876_vm8 = vcmp.eq.f32.partialorder %v872_v33, inf  ;;  %v879_v42 = vand.u32 2147483648, %v872_v33  ;;  %vm878_vm9 = vcmp.eq.f32.partialorder %v872_v33, 0.0 }
 0x622   :  { %v1548_v34 = vpop.eup %1547 }
 0x623   :  { %v882_v35 = vmul.f32 %v1548_v34, %v873_v31 }
 0x624   :  { %v1550_v37 = vpop.eup %1549 }
 0x625   :  { %v884_v38 = vsel %vm883_vm6, %v873_v31, %v882_v35  ;;  %v875_v40 = vmul.f32 %v1550_v37, %v872_v33 }
 0x626   :  { %v887_v39 = vsel %vm885_vm7, %v886_v36, %v884_v38 }
 0x627   :  { %v889_v41 = vadd.f32 1e-05, %v887_v39  ;;  %v877_v43 = vsel %vm876_vm8, %v872_v33, %v875_v40 }
 0x628   :  { %v880_v44 = vsel %vm878_vm9, %v879_v42, %v877_v43 }
 0x629   :  { %1551 = vrcp.f32 %v889_v41  ;;  %v888_v45 = vadd.f32 1e-05, %v880_v44 }
 0x62b   :  { %1553 = vrcp.f32 %v888_v45 }
 0x636   :  { %v1552_v46 = vpop.eup %1551 }
 0x637   :  { %v893_v48 = vmul.f32 %v1552_v46, %v1951_v17 }
 0x638   :  { %v1554_v47 = vpop.eup %1553 }
 0x639   :  { %v892_v50 = vmul.f32 %v1554_v47, %v1954_v19  ;;  %v901_v52 = vmul.f32 %v1221_v49, %v893_v48 }
 0x63b   :  { %v900_v51 = vmul.f32 %v1221_v49, %v892_v50 }
 0x63d   :  { %1495 = vmatprep.mubr.msk.f32.mxu0 %vm53_vm0, %v900_v51  ;;  %1506 = vmatprep.mubr.msk.f32.mxu1 %vm53_vm0, %v900_v51 }
 0x63e   :  { %1496 = vmatmul.mubr.msk.f32.vlgmr.msra.gmra.mxu0 %vm53_vm0, %v901_v52  ;;  %1507 = vmatmul.mubr.msk.f32.vlgmr.msra.gmra.mxu1 %vm53_vm0, %v901_v52 }
 0x63f   :  { %1510 = vmatpush3.msra.mxu0 %v1089_v53 }
 0x640   :  { %1511 = vmatprep.subr.mxu0 %v1088_v54 }
 0x641   :  { %1512 = vmatpush3.msra.mxu0 %v1088_v54 }
 0x642   :  { %1513 = vmatprep.subr.mxu0 %v1087_v55 }
 0x643   :  { %1514 = vmatpush3.msra.mxu0 %v1087_v55 }
 0x644   :  { %1515 = vmatprep.subr.mxu0 %v1086_v56 }
 0x645   :  { %1516 = vmatpush3.msra.mxu0 %v1086_v56 }
 0x646   :  { %1517 = vmatprep.subr.mxu0 %v1085_v57 }
 0x647   :  { %1518 = vmatpush3.msra.mxu0 %v1085_v57 }
 0x648   :  { %1519 = vmatprep.subr.mxu0 %v1084_v58 }
 0x649   :  { %1520 = vmatpush3.msra.mxu0 %v1084_v58 }
 0x64a   :  { %1521 = vmatprep.subr.mxu0 %v1083_v59 }
 0x64b   :  { %1522 = vmatpush3.msra.mxu0 %v1083_v59 }
 0x64c   :  { %1523 = vmatprep.subr.mxu0 %v1082_v60 }
 0x64d   :  { %1524 = vmatpush3.msra.mxu0 %v1082_v60 }
 0x6fe   :  { %v1497_v61 = vpop.f32.mrf.mxu0  ;;  %v1508_v62 = vpop.f32.mrf.mxu1 }
 0x6ff   :  { %v1067_v63 = vmul.f32 %v1508_v62, %v1497_v61 }
 0x700   :  { %v978_v2 = vpop.f32.mrf.mxu0  ;;  %v1057_v3 = vpop.f32.mrf.mxu1 }
 0x701   :  { %v1227_v4 = vmul.f32 -1.442695, %v1067_v63  ;;  %v1066_v5 = vmul.f32 %v1057_v3, %v978_v2 }
 0x703   :  { %1555 = vpow2.f32 %v1227_v4  ;;  %v1226_v6 = vmul.f32 -1.442695, %v1066_v5 }
 0x705   :  { %1557 = vpow2.f32 %v1226_v6 }
 0x710   :  { %v1556_v7 = vpop.eup %1555 }
 0x711   :  { %v1075_v8 = vadd.f32 1.0, %v1556_v7 }
 0x712   :  { %v1558_v9 = vpop.eup %1557 }
 0x713   :  { %v1074_v10 = vadd.f32 1.0, %v1558_v9  ;;  %1559 = vrcp.f32 %v1075_v8 }
 0x715   :  { %1561 = vrcp.f32 %v1074_v10 }
 0x720   :  { %v1560_v11 = vpop.eup %1559 }
 0x721   :  { %v1081_v14 = vmul.f32 %v1560_v11, %v1067_v63 }
 0x722   :  { %v1562_v12 = vpop.eup %1561 }
 0x723   :  { %v1080_v13 = vmul.f32 %v1562_v12, %v1066_v5 }
 0x725   :  { %1525 = vmatprep.mubr.msk.f32.mxu0 %vm1090_vm10, %v1080_v13 }
 0x726   :  { %1526 = vmatmul.mubr.msk.f32.vlgmr.msra.gmra.mxu0 %vm1090_vm10, %v1081_v14 }
 0x7e6   :  { %v1527_v15 = vpop.f32.mrf.mxu0 }
 0x7e7   :  { %v1173_v16 = vadd.f32 %v1527_v15, %v1951_v17 }
 0x7e8   :  { %v1163_v18 = vpop.f32.mrf.mxu0 }
 0x7e9   :  { %1175 = vst.msk [vmem:[#allocation2 + $0x8] sm:$0xff] %vm53_vm0, %v1173_v16  ;;  %v1172_v20 = vadd.f32 %v1163_v18, %v1954_v19 }
 0x7eb   :  { %1174 = vst.msk [vmem:[#allocation2] sm:$0xff] %vm53_vm0, %v1172_v20 }
 0x7ec   :  { %1574 = shalt.err (!%p1571_p4)
}
 0x7ed   :  { %s1586_s3 = smov 128   ;;  %s1587_s0 = smov 8  }
 0x7ee   :  { %1187 = dma.vmem_to_hbm [thread:$0]  %s1182_s19, 256, %s2040_s14, [#allocation3], %s1586_s3, %s1586_s3, %s1587_s0  }
 0x7ef   :  { %1583 = dma.done.wait [#allocation3], 256  }
 0x7f0   :  { %1584 = vsyncadd [#allocation3], 4294967040 }
 0x7f1   :  { %1191 = vsyncpa [#allocation3], 1 }

</bundles_post_ra>
